<compile_context>
chip_gen: v6e
topology: v6e:2x2x1
jax: 0.10.0
libtpu: 0.0.40
codegen_flags: <defaults>
</compile_context>

<pallas_src>
import math
from functools import partial

import jax
import jax.numpy as jnp
from jax.experimental import pallas as pl
from jax.experimental.pallas import tpu as pltpu

_INV_SQRT2 = 1.0 / math.sqrt(2.0)
_SQRT_2_OVER_PI = math.sqrt(2.0 / math.pi)


def _gelu2(y, approx_gelu):
    """Returns 2*GELU(y); the 0.5 factor is pre-folded into the BN scale."""
    if approx_gelu:
        # tanh approximation -> EUP slot (frees VALU on v7x); ~1e-3 numeric deviation.
        inner = _SQRT_2_OVER_PI * (y + 0.044715 * (y * y * y))
        return y * (1.0 + jnp.tanh(inner))
    return y * (1.0 + jax.lax.erf(y * _INV_SQRT2))


def _input_conv_kernel(x_ref, w_ref, p_ref, *rest, approx_gelu, skip):
    # x_ref: (Cin, tl)    input block, length in lanes
    # w_ref: (Cout, Cin)  conv1d weight (k=1 squeezed), resident across the grid
    # p_ref: (Cout, 3)    packed [conv_bias, 0.5*gamma/sqrt(var+eps), beta - mean*scale]
    # rest:  (sc_ref, o_ref) if skip else (o_ref,); sc/o are (Cout, tl)
    if skip:
        sc_ref, o_ref = rest
    else:
        (o_ref,) = rest

    p = p_ref[...]
    bias = p[:, 0:1]
    scale_half = p[:, 1:2]
    shift = p[:, 2:3]

    y = jnp.dot(w_ref[...], x_ref[...], preferred_element_type=jnp.float32) + bias
    z = _gelu2(y, approx_gelu) * scale_half + shift
    if skip:
        z = z + sc_ref[...].astype(jnp.float32)
    o_ref[...] = z.astype(o_ref.dtype)


def _select_lane_tile(L, Cin, Cout, itemsize, skip, tl_target, vmem_block_budget):
    """Largest lane tile (multiple of 128) under the VMEM block budget."""
    L128 = ((L + 127) // 128) * 128
    n_io = 2 if skip else 1
    # double-buffered x / out / (sc) blocks + f32 intermediates margin, per lane
    bytes_per_lane = 2 * itemsize * Cin + 2 * itemsize * Cout * n_io + 2 * 4 * Cout
    max_tl = max(128, (vmem_block_budget // bytes_per_lane) // 128 * 128)
    tl_target = ((tl_target + 127) // 128) * 128
    return min(tl_target, L128, max_tl), L128


def input_conv_forward(x_ncl, sc_ncl, w_oik, bias_o, gamma, beta,
                       running_mean, running_var, *, eps=1e-3, skip=True,
                       approx_gelu=False, tl_target=8192,
                       vmem_block_budget=32 * 1024 * 1024):
    """Eval-mode InputConv forward.

    x_ncl: (N, Cin, L); sc_ncl: (N, Cout, L) (ignored if skip=False).
    Returns (N, Cout, L).
    """
    N, Cin, L = x_ncl.shape
    Cout = w_oik.shape[0]
    itemsize = jnp.dtype(x_ncl.dtype).itemsize

    tl, L128 = _select_lane_tile(L, Cin, Cout, itemsize, skip,
                                 tl_target, vmem_block_budget)
    # Megacore (v7x, 2 TCs): avoid a degenerate 1x1 grid when L allows splitting.
    if N * pl.cdiv(L128, tl) < 2 and L128 >= 256:
        tl = ((L128 // 2 + 127) // 128) * 128

    # Fold conv bias + eval-mode BN into a single (Cout, 3) param block:
    #   y   = W x + b
    #   out = [y * (1 + erf(y/sqrt2))] * (0.5*gamma/sqrt(var+eps)) + (beta - mean*scale)
    w2d = w_oik[:, :, 0]                                              # (Cout, Cin)
    scale = gamma.astype(jnp.float32) / jnp.sqrt(running_var.astype(jnp.float32) + eps)
    shift = beta.astype(jnp.float32) - running_mean.astype(jnp.float32) * scale
    params = jnp.stack([bias_o.astype(jnp.float32), 0.5 * scale, shift], axis=1)

    grid = (N, pl.cdiv(L, tl))   # partial tail block handled by Pallas masking

    x_spec = pl.BlockSpec((None, Cin, tl), lambda n, l: (n, 0, l))
    w_spec = pl.BlockSpec((Cout, Cin), lambda n, l: (0, 0))
    p_spec = pl.BlockSpec((Cout, 3), lambda n, l: (0, 0))
    io_spec = pl.BlockSpec((None, Cout, tl), lambda n, l: (n, 0, l))

    if skip:
        in_specs = [x_spec, w_spec, p_spec, io_spec]
        operands = (x_ncl, w2d, params, sc_ncl)
    else:
        in_specs = [x_spec, w_spec, p_spec]
        operands = (x_ncl, w2d, params)

    kernel = partial(_input_conv_kernel, approx_gelu=approx_gelu, skip=skip)

    n_io = 2 if skip else 1
    cost = pl.CostEstimate(
        flops=2 * N * Cout * Cin * L,
        transcendentals=N * Cout * L,
        bytes_accessed=itemsize * (N * Cin * L + n_io * N * Cout * L),
    )

    return pl.pallas_call(
        kernel,
        out_shape=jax.ShapeDtypeStruct((N, Cout, L), x_ncl.dtype),
        grid_spec=pltpu.PrefetchScalarGridSpec(
            num_scalar_prefetch=0,
            grid=grid,
            in_specs=in_specs,
            out_specs=io_spec,
        ),
        compiler_params=pltpu.CompilerParams(
            dimension_semantics=("parallel", "parallel"),
            vmem_limit_bytes=48 * 1024 * 1024,   # above default scoped limit, under v7x 64 MiB
        ),
        cost_estimate=cost,
    )(*operands)


def _reference(x_ncl, sc_ncl, w_oik, bias_o, gamma, beta, rm, rv, eps=1e-3, skip=True):
    # pure-JAX reference of the eval-mode forward (exact-erf GELU)
    y = jnp.einsum('ncl,oc->nol', x_ncl, w_oik[:, :, 0]) + bias_o[None, :, None]
    g = 0.5 * y * (1.0 + jax.lax.erf(y / jnp.sqrt(2.0)))
    z = (g - rm[None, :, None]) / jnp.sqrt(rv[None, :, None] + eps)
    z = z * gamma[None, :, None] + beta[None, :, None]
    return sc_ncl + z if skip else z


if __name__ == "__main__":
    key = jax.random.PRNGKey(0)
    # small demo shapes; L deliberately NOT a multiple of 128 to exercise the
    # maskless-wrapper / masked-tail-block path.
    N, Cin, Cout, L = 2, 16, 32, 500

    ks = jax.random.split(key, 8)
    x = jax.random.normal(ks[0], (N, Cin, L), dtype=jnp.float32)
    sc = jax.random.normal(ks[1], (N, Cout, L), dtype=jnp.float32)

    # deterministic synthetic parameters (shapes per nn.Conv1d / nn.BatchNorm1d)
    w = jax.random.normal(ks[2], (Cout, Cin, 1), dtype=jnp.float32) * (1.0 / math.sqrt(Cin))
    b = jax.random.normal(ks[3], (Cout,), dtype=jnp.float32) * 0.1
    gamma = 1.0 + 0.1 * jax.random.normal(ks[4], (Cout,), dtype=jnp.float32)
    beta = 0.1 * jax.random.normal(ks[5], (Cout,), dtype=jnp.float32)
    running_mean = 0.1 * jax.random.normal(ks[6], (Cout,), dtype=jnp.float32)
    running_var = 1.0 + 0.1 * jax.random.uniform(ks[7], (Cout,), dtype=jnp.float32)

    # skip=True path
    out = input_conv_forward(x, sc, w, b, gamma, beta, running_mean, running_var,
                             eps=1e-3, skip=True)
    out = jax.block_until_ready(out)
    ref = _reference(x, sc, w, b, gamma, beta, running_mean, running_var,
                     eps=1e-3, skip=True)
    assert out.shape == (N, Cout, L)
    assert jnp.allclose(out, ref, atol=1e-4, rtol=1e-4)

    # skip=False path (specialized kernel: no sc operand DMA'd at all)
    out_ns = input_conv_forward(x, None, w, b, gamma, beta, running_mean, running_var,
                                eps=1e-3, skip=False)
    out_ns = jax.block_until_ready(out_ns)
    ref_ns = _reference(x, sc, w, b, gamma, beta, running_mean, running_var,
                        eps=1e-3, skip=False)
    assert jnp.allclose(out_ns, ref_ns, atol=1e-4, rtol=1e-4)

    print("KERNEL_OK")
</pallas_src>

<mosaic_0001>
module attributes {stable_mosaic.version = 11 : i64} {
  func.func @_input_conv_kernel(%arg0: i32, %arg1: i32, %arg2: memref<1x16x512xf32, #tpu.memory_space<vmem>>, %arg3: memref<32x16xf32, #tpu.memory_space<vmem>>, %arg4: memref<32x3xf32, #tpu.memory_space<vmem>>, %arg5: memref<1x32x512xf32, #tpu.memory_space<vmem>>, %arg6: memref<1x32x512xf32, #tpu.memory_space<vmem>>) attributes {dimension_semantics = [#tpu.dimension_semantics<parallel>, #tpu.dimension_semantics<parallel>], iteration_bounds = array<i64: 2, 1>, scalar_prefetch = 0 : i64, scratch_operands = 0 : i64, tpu.core_type = #tpu.core_type<tc>, window_params = [{transform_indices = @transform_0, window_bounds = array<i64: 1, 16, 512>}, {pipeline_mode = #tpu.pipeline_mode<synchronous>, transform_indices = @transform_1, window_bounds = array<i64: 32, 16>}, {pipeline_mode = #tpu.pipeline_mode<synchronous>, transform_indices = @transform_2, window_bounds = array<i64: 32, 3>}, {transform_indices = @transform_3, window_bounds = array<i64: 1, 32, 512>}, {transform_indices = @transform_4, window_bounds = array<i64: 1, 32, 512>}]} {
    %c0 = arith.constant 0 : index
    %c0_0 = arith.constant 0 : index
    %0 = vector.load %arg4[%c0, %c0_0] : memref<32x3xf32, #tpu.memory_space<vmem>>, vector<32x3xf32>
    %1 = vector.extract_strided_slice %0 {offsets = [0, 0], sizes = [32, 1], strides = [1, 1]} : vector<32x3xf32> to vector<32x1xf32>
    %2 = vector.extract_strided_slice %0 {offsets = [0, 1], sizes = [32, 1], strides = [1, 1]} : vector<32x3xf32> to vector<32x1xf32>
    %3 = vector.extract_strided_slice %0 {offsets = [0, 2], sizes = [32, 1], strides = [1, 1]} : vector<32x3xf32> to vector<32x1xf32>
    %c0_1 = arith.constant 0 : index
    %c0_2 = arith.constant 0 : index
    %4 = vector.load %arg3[%c0_1, %c0_2] : memref<32x16xf32, #tpu.memory_space<vmem>>, vector<32x16xf32>
    %c0_3 = arith.constant 0 : index
    %c0_4 = arith.constant 0 : index
    %c0_5 = arith.constant 0 : index
    %5 = vector.load %arg2[%c0_3, %c0_4, %c0_5] : memref<1x16x512xf32, #tpu.memory_space<vmem>>, vector<1x16x512xf32>
    %6 = vector.shape_cast %5 : vector<1x16x512xf32> to vector<16x512xf32>
    %cst = arith.constant dense<0.000000e+00> : vector<32x512xf32>
    %7 = tpu.matmul %4, %6, %cst {dimension_numbers = #tpu.dot_dimension_numbers<[1], [0], [0], [1], [0, 0, 1, 1], [], []>} : vector<32x16xf32>, vector<16x512xf32>, vector<32x512xf32> -> vector<32x512xf32>
    %8 = vector.broadcast %1 : vector<32x1xf32> to vector<32x512xf32>
    %9 = arith.addf %7, %8 : vector<32x512xf32>
    %cst_6 = arith.constant 0.707106769 : f32
    %10 = vector.broadcast %cst_6 : f32 to vector<32x512xf32>
    %11 = arith.mulf %9, %10 : vector<32x512xf32>
    %12 = math.erf %11 : vector<32x512xf32>
    %cst_7 = arith.constant 1.000000e+00 : f32
    %13 = vector.broadcast %cst_7 : f32 to vector<32x512xf32>
    %14 = arith.addf %13, %12 : vector<32x512xf32>
    %15 = arith.mulf %9, %14 : vector<32x512xf32>
    %16 = vector.broadcast %2 : vector<32x1xf32> to vector<32x512xf32>
    %17 = arith.mulf %15, %16 : vector<32x512xf32>
    %18 = vector.broadcast %3 : vector<32x1xf32> to vector<32x512xf32>
    %19 = arith.addf %17, %18 : vector<32x512xf32>
    %c0_8 = arith.constant 0 : index
    %c0_9 = arith.constant 0 : index
    %c0_10 = arith.constant 0 : index
    %20 = vector.load %arg5[%c0_8, %c0_9, %c0_10] : memref<1x32x512xf32, #tpu.memory_space<vmem>>, vector<1x32x512xf32>
    %21 = vector.shape_cast %20 : vector<1x32x512xf32> to vector<32x512xf32>
    %22 = arith.addf %19, %21 : vector<32x512xf32>
    %c0_11 = arith.constant 0 : index
    %c0_12 = arith.constant 0 : index
    %c0_13 = arith.constant 0 : index
    %23 = vector.load %arg6[%c0_11, %c0_12, %c0_13] : memref<1x32x512xf32, #tpu.memory_space<vmem>>, vector<1x32x512xf32>
    %24 = vector.shape_cast %23 : vector<1x32x512xf32> to vector<32x512xf32>
    %25 = vector.shape_cast %22 : vector<32x512xf32> to vector<1x32x512xf32>
    tpu.vector_store %arg6[%c0_11, %c0_12, %c0_13], %25 {strides = array<i32>} : memref<1x32x512xf32, #tpu.memory_space<vmem>>, vector<1x32x512xf32>,
    return
  }
  func.func @transform_0(%arg0: i32, %arg1: i32) -> (i32, i32, i32) {
    %c0_i32 = arith.constant 0 : i32
    %c0_i32_0 = arith.constant 0 : i32
    return %arg0, %c0_i32, %arg1 : i32, i32, i32
  }
  func.func @transform_1(%arg0: i32, %arg1: i32) -> (i32, i32) {
    %c0_i32 = arith.constant 0 : i32
    %c0_i32_0 = arith.constant 0 : i32
    %c0_i32_1 = arith.constant 0 : i32
    return %c0_i32, %c0_i32_0 : i32, i32
  }
  func.func @transform_2(%arg0: i32, %arg1: i32) -> (i32, i32) {
    %c0_i32 = arith.constant 0 : i32
    %c0_i32_0 = arith.constant 0 : i32
    %c0_i32_1 = arith.constant 0 : i32
    return %c0_i32, %c0_i32_0 : i32, i32
  }
  func.func @transform_3(%arg0: i32, %arg1: i32) -> (i32, i32, i32) {
    %c0_i32 = arith.constant 0 : i32
    %c0_i32_0 = arith.constant 0 : i32
    return %arg0, %c0_i32, %arg1 : i32, i32, i32
  }
  func.func @transform_4(%arg0: i32, %arg1: i32) -> (i32, i32, i32) {
    %c0_i32 = arith.constant 0 : i32
    %c0_i32_0 = arith.constant 0 : i32
    return %arg0, %c0_i32, %arg1 : i32, i32, i32
  }
}

</mosaic_0001>

<bundles_post_ra>
// kernel: tpu_custom_call.1
= control target key start
LH: loop header
LB: loop body
LE: loop exit
PB: predicated region body
PF: predicated region fallthrough
CT: control target
= control target key end

     0   :  { %s1465_s0 = inlined_call_operand.hbm [shape: f32[2,16,500], index: 0, kind: input, shape index: {}]   ;;  %s1466_s1 = inlined_call_operand.vmem [shape: f32[32,16], index: 1, kind: input, shape index: {}]   ;;  %s1467_s2 = inlined_call_operand.vmem [shape: f32[32,3], index: 2, kind: input, shape index: {}]   ;;  %s1468_s3 = inlined_call_operand.hbm [shape: f32[2,32,500], index: 3, kind: input, shape index: {}]   ;;  %s1469_s4 = inlined_call_operand.hbm [shape: f32[2,32,500], index: 4, kind: output, shape index: {}]  }
   0x1   :  { %1471 = sst [smem:[#allocation12_spill]] %s1465_s0 }
   0x2   :  { %9 = vsyncpa [#allocation3], 0 }
   0x3   :  { %11 = vsyncpa [#allocation3 + $0x1], 0 }
   0x4   :  { %12 = vsyncpa [#allocation6], 0 }
   0x5   :  { %14 = vsyncpa [#allocation6 + $0x1], 0 }
   0x6   :  { %15 = vsyncpa [#allocation4], 0 }
   0x7   :  { %17 = vsyncpa [#allocation4 + $0x1], 0  ;;  %s1134_s15 = smov 0   ;;  %s1136_s16 = smov 0  }
   0x8   :  { %s1138_s17 = smov 0   ;;  %s1140_s18 = smov 0  }
   0x9   :  { %s1142_s19 = smov 0   ;;  %s1144_s20 = smov 0  }
   0xa LB: > { %s813_s21 = sadd.s32 4294967295, %s1096_s20   ;;  %s814_s22 = sadd.s32 4294967294, %s1096_s20   ;;  %s1096_s20 = sphi %s1144_s20, %s23_s20   ;;  %s1092_s19 = sphi %s1142_s19, %s1485_s19   ;;  %s1088_s18 = sphi %s1140_s18, %s1484_s18   ;;  %s1084_s17 = sphi %s1138_s17, %s1483_s17   ;;  %s1080_s16 = sphi %s1136_s16, %s1482_s16   ;;  %s1076_s15 = sphi %s1134_s15, %s1481_s15  }
   0xb   : > { %s35_s23 = sadd.s32 1, %s1092_s19  ;;  %s44_s24 = sadd.s32 1, %s1084_s17 }
   0xc   : > { %p37_p0 = scmp.ge.s32.totalorder %s35_s23, 2  ;;  %p51_p1 = scmp.ne.s32.totalorder %s1084_s17, %s1080_s16 }
   0xd   : > { %p52_p2 = scmp.eq.s32.totalorder %s1096_s20, 0  ;;  %p57_p3 = scmp.ne.s32.totalorder %s1080_s16, %s1076_s15 }
   0xe   : > { %s1487_s23 = smov (%p37_p0, %s35_s23), 0  ;;  %p58_p5 = scmp.eq.s32.totalorder %s813_s21, 0 }
   0xf   : > { %1472 = sst [smem:[#allocation11_spill]] %s1487_s23  ;;  %p1175_p4 = por %p52_p2, %p51_p1 }
  0x10   : > { %s39_s26 = ssub.s32 %s1092_s19, %s1487_s23  ;;  %p153_p6 = scmp.eq.s32.totalorder %s813_s21, 1 }
  0x11   : > { %p42_p7 = scmp.eq.s32.totalorder %s39_s26, 0  ;;  %p1181_p8 = por %p58_p5, %p57_p3 }
  0x12   : > { %p1185_p9 = por %p153_p6, %p51_p1  ;;  %p159_p10 = scmp.eq.s32.totalorder %s814_s22, 1 }
  0x13   : > { %s1190_s29 = scalar_select %p42_p7, %s1084_s17, %s44_s24  }
  0x14   : > { %p1192_p11 = por %p159_p10, %p57_p3  ;;  %p816_p12 = scmp.ge.s32.totalorder %s1096_s20, 2 }
  0x15   : > { %p860_p13 = scmp.lt.s32.totalorder %s1096_s20, 2  ;;  %s1199_s5 = sand.u32 1, %s1084_s17  }
  0x16   : > { %s817_s6 = sshll.u32 %s1199_s5, 6  ;;  %s840_s7 = sshll.u32 %s1092_s19, 10 }
  0x17   : > { %s1477_s0 = sld [smem:[#allocation12_spill]]  ;;  %s189_s11 = scalar_lea.vmem [#allocation2], %s817_s6 }
  0x18   : > { %s198_s12 = sshll.u32 %s189_s11, 4  ;;  %p1208_p0 = pnand %p860_p13, %p1175_p4  ;;  %s199_s12 = int_to_ptr.vmem [resolvable:$true] %s198_s12 }
  0x19   : > { %p823_p1 = scmp.ge.s32.totalorder %s1096_s20, 1  ;;  %s186_s14 = scalar_lea.sflag [#allocation3], %s1199_s5 }
  0x1a   : > { %p958_p2 = pneg %p1208_p0  ;;  %s969_s21 = scalar_lea.vmem %s199_s12, 1024 }
  0x1b   : > { %p970_p3 = scmp.ne.s32.totalorder %s199_s12, %s969_s21  ;;  %s1098_s22 = smov [#allocation2]  }
  0x1c   : > { %s974_s24 = sshll.u32 %s1098_s22, 4  ;;  %s975_s24 = int_to_ptr.vmem [resolvable:$false] %s974_s24 }
  0x1d   : > { %s197_s10 = scalar_lea.hbm %s1477_s0, %s840_s7  ;;  %p972_p5 = pnand %p970_p3, %p958_p2 }
  0x1e   : > { %s976_s25 = scalar_lea.vmem %s975_s24, 2048  ;;  %p977_p4 = scmp.lt.s32.totalorder %s199_s12, %s975_s24 }
  0x1f   : > { %p973_p6 = pneg %p972_p5  ;;  %p978_p7 = scmp.lt.s32.totalorder %s976_s25, %s969_s21 }
  0x21   : > { %p979_p10 = por %p978_p7, %p977_p4 }
  0x23   : > { %p980_p13 = pnand %p979_p10, %p973_p6 }
  0x25   : > { %983 = shalt.err (!%p980_p13)
}
  0x26   : > { %s1099_s26 = smov 512   ;;  %s1100_s6 = smov 32  }
  0x27   : > { %852 = dma.hbm_to_vmem [thread:$0]  (!%p1208_p0), %s197_s10, 1024, %s199_s12, %s186_s14, %s1099_s26, %s1099_s26, %s1100_s6  }
  0x28   : > { %p229_p3 = scmp.lt.s32.totalorder %s1096_s20, 3  ;;  %s820_s7 = sshll.u32 %s1199_s5, 7 }
  0x29   : > { %s841_s8 = sshll.u32 %s1092_s19, 11  ;;  %s212_s24 = scalar_lea.vmem [#allocation5], %s820_s7 }
  0x2a   : > { %p1226_p5 = pnand %p823_p1, %p229_p3  ;;  %s220_s22 = scalar_lea.hbm %s1468_s3, %s841_s8 }
  0x2b   : > { %s221_s25 = sshll.u32 %s212_s24, 4  ;;  %s209_s0 = scalar_lea.sflag [#allocation6], %s1199_s5  ;;  %s222_s25 = int_to_ptr.vmem [resolvable:$true] %s221_s25 }
  0x2c   : > { %s997_s23 = scalar_lea.vmem %s222_s25, 2048  ;;  %s1101_s10 = smov [#allocation5]  }
  0x2d   : > { %p998_p6 = scmp.ne.s32.totalorder %s222_s25, %s997_s23  ;;  %s1002_s12 = sshll.u32 %s1101_s10, 4  ;;  %s1003_s12 = int_to_ptr.vmem [resolvable:$false] %s1002_s12 }
  0x2e   : > { %s1004_s14 = scalar_lea.vmem %s1003_s12, 4096  ;;  %p1005_p1 = scmp.lt.s32.totalorder %s222_s25, %s1003_s12 }
  0x2f   : > { %p1000_p4 = pnand %p998_p6, %p958_p2  ;;  %p1006_p10 = scmp.lt.s32.totalorder %s1004_s14, %s997_s23 }
  0x31   : > { %p1001_p7 = pneg %p1000_p4  ;;  %p1007_p13 = por %p1006_p10, %p1005_p1 }
  0x33   : > { %p1008_p3 = pnand %p1007_p13, %p1001_p7 }
  0x35   : > { %1011 = shalt.err (!%p1008_p3)
}
  0x36   : > { %855 = dma.hbm_to_vmem [thread:$0]  (!%p1208_p0), %s220_s22, 2048, %s222_s25, %s209_s0, %s1099_s26, %s1099_s26, %s1100_s6  }
  0x37   : > { %233 = sbr.rel (%p1226_p5) target bundleno = 323 (0x143), region = 36  ;;  %s1242_s5 = sand.u32 (!%p1226_p5), 1, %s1080_s16  }
  0x38   : > { %s824_s7 = sshll.u32 (!%p1226_p5), %s1242_s5, 6  ;;  %s236_s8 = scalar_lea.sflag (!%p1226_p5), [#allocation3], %s1242_s5 }
  0x39   : > { %s239_s11 = scalar_lea.vmem (!%p1226_p5), [#allocation2], %s824_s7 }
  0x3c   : > { %1063 = dma.done.wait (%p1181_p8), %s236_s8, 1024  }
  0x3d   : > { %1065 = vsyncadd (%p1181_p8), %s236_s8, 4294966272  ;;  %s825_s0 = sshll.u32 %s1242_s5, 7  ;;  %s245_s23 = scalar_lea.sflag [#allocation6], %s1242_s5 }
  0x3e   : > { %s1254_s13 = scalar_lea.vmem [#allocation5], %s825_s0 }
  0x3f   : > { %1067 = dma.done.wait (%p1181_p8), %s245_s23, 2048  }
  0x40   : > { %1069 = vsyncadd (%p1181_p8), %s245_s23, 4294965248  ;;  %v1102_v0 = vmov 0.0   ;;  %v1103_v1 = vmov 0   ;;  %v294_v2 = vld [vmem:[%s239_s11 + $0x28] sm:$0xff]  ;;  %v296_v3 = vld [vmem:[%s239_s11 + $0x38] sm:$0xff]  ;;  %vm317_vm0 = vcmask 130048  }
  0x41   : > { %394 = vmatprep.mubr.f32.mxu0 %v1102_v0  ;;  %483 = vmatprep.mubr.f32.mxu1 %v1102_v0  ;;  %v293_v4 = vld [vmem:[%s239_s11 + $0x20] sm:$0xff]  ;;  %v295_v5 = vld [vmem:[%s239_s11 + $0x30] sm:$0xff]  ;;  %v290_v6 = vld [vmem:[%s239_s11 + $0x8] sm:$0xff]  ;;  %v1104_v18 = vmov 1   ;;  %v1105_v19 = vmov 2   ;;  %s1361_s26 = scalar_lea.vmem [#allocation7], %s825_s0 }
  0x42   : > { %918 = vset.pattern.permute.xlu0 %v1103_v1  ;;  %919 = vset.pattern.permute.xlu1 %v1103_v1  ;;  %v292_v7 = vld [vmem:[%s239_s11 + $0x18] sm:$0xff]  ;;  %v289_v8 = vld [vmem:[%s239_s11] sm:$0xff]  ;;  %v291_v9 = vld [vmem:[%s239_s11 + $0x10] sm:$0xff]  ;;  %s842_s0 = sshll.u32 %s1088_s18, 11  ;;  %s700_s6 = sshll.u32 %s1361_s26, 4  ;;  %s1413_s6 = int_to_ptr.vmem [resolvable:$true] %s700_s6 }
  0x43   : > { %358 = vmatprep.subr.mxu0 %v294_v2  ;;  %447 = vmatprep.subr.mxu1 %v296_v3  ;;  %v285_v10 = vld [vmem:[%s1466_s1] sm:$0xff]  ;;  %v283_v12 = vld [vmem:[%s1467_s2 + $0x10] sm:$0xff]  ;;  %v286_v13 = vld [vmem:[%s1466_s1 + $0x8] sm:$0xff]  ;;  %s1411_s21 = scalar_lea.hbm %s1469_s4, %s842_s0  ;;  %s1012_s22 = scalar_lea.vmem %s1413_s6, 2048 }
  0x44   : > { %359 = vmatpush1.msra.mxu0 %v293_v4  ;;  %448 = vmatpush1.msra.mxu1 %v295_v5  ;;  %v281_v11 = vld [vmem:[%s1467_s2] sm:$0xff]  ;;  %v282_v14 = vld [vmem:[%s1467_s2 + $0x8] sm:$0xff]  ;;  %v284_v15 = vld [vmem:[%s1467_s2 + $0x18] sm:$0xff]  ;;  %p1013_p8 = scmp.ne.s32.totalorder %s1413_s6, %s1012_s22  ;;  %s1106_s24 = smov [#allocation7]  }
  0x45   : > { %360 = vmatprep.subr.mxu0 %v290_v6  ;;  %449 = vmatprep.subr.mxu1 %v292_v7  ;;  %v287_v16 = vld [vmem:[%s1466_s1 + $0x10] sm:$0xff]  ;;  %v288_v17 = vld [vmem:[%s1466_s1 + $0x18] sm:$0xff]  ;;  %s1016_s25 = sshll.u32 %s1106_s24, 4  ;;  %s1017_s25 = int_to_ptr.vmem [resolvable:$false] %s1016_s25 }
  0x46   : > { %361 = vmatpush1.msra.mxu0 %v289_v8  ;;  %450 = vmatpush1.msra.mxu1 %v291_v9  ;;  %p1014_p0 = pnand %p1013_p8, %p1185_p9  ;;  %s1018_s10 = scalar_lea.vmem %s1017_s25, 4096 }
  0x47   : > { %827 = vmatmul.mubr.msk.f32.vlgmr.msra.gmra.mxu0 %vm317_vm0, %v285_v10  ;;  %831 = vmatmul.mubr.msk.f32.vlgmr.msra.gmra.mxu1 %vm317_vm0, %v285_v10  ;;  %p1019_p5 = scmp.lt.s32.totalorder %s1413_s6, %s1017_s25  ;;  %p1020_p6 = scmp.lt.s32.totalorder %s1018_s10, %s1012_s22 }
  0x48   : > { %400 = vmatprep.mubr.f32.mxu0 %v1102_v0  ;;  %489 = vmatprep.mubr.f32.mxu1 %v1102_v0  ;;  %p1015_p2 = pneg %p1014_p0 }
  0x49   : > { %299 = vperm.xlu0 %918, %v281_v11   ;;  %309 = vperm.xlu1 %919, %v283_v12   ;;  %p1021_p4 = por %p1020_p6, %p1019_p5 }
  0x4b   : > { %828 = vmatmul.mubr.msk.f32.gmra.mxu0 %vm317_vm0, %v286_v13  ;;  %832 = vmatmul.mubr.msk.f32.gmra.mxu1 %vm317_vm0, %v286_v13  ;;  %p1022_p7 = pnand %p1021_p4, %p1015_p2 }
  0x4c   : > { %406 = vmatprep.mubr.f32.mxu0 %v1102_v0  ;;  %495 = vmatprep.mubr.f32.mxu1 %v1102_v0 }
  0x4d   : > { %304 = vperm.xlu0 %918, %v282_v14   ;;  %314 = vperm.xlu1 %919, %v284_v15  }
  0x4f   : > { %829 = vmatmul.mubr.msk.f32.gmra.mxu0 %vm317_vm0, %v287_v16  ;;  %833 = vmatmul.mubr.msk.f32.gmra.mxu1 %vm317_vm0, %v287_v16 }
  0x50   : > { %412 = vmatprep.mubr.f32.mxu0 %v1102_v0  ;;  %501 = vmatprep.mubr.f32.mxu1 %v1102_v0 }
  0x51   : > { %921 = vset.pattern.permute.xlu1 %v1104_v18  ;;  %920 = vset.pattern.permute.xlu0 %v1104_v18 }
  0x52   : > { %577 = vperm.xlu1 %921, %v282_v14   ;;  %573 = vperm.xlu0 %920, %v281_v11  }
  0x53   : > { %830 = vmatmul.mubr.msk.f32.gmra.mxu0 %vm317_vm0, %v288_v17  ;;  %834 = vmatmul.mubr.msk.f32.gmra.mxu1 %vm317_vm0, %v288_v17 }
  0x56   : > { %581 = vperm.xlu1 %921, %v283_v12   ;;  %585 = vperm.xlu0 %920, %v284_v15  }
  0x5a   : > { %922 = vset.pattern.permute.xlu1 %v1105_v19  ;;  %923 = vset.pattern.permute.xlu0 %v1105_v19 }
  0x5b   : > { %605 = vperm.xlu1 %922, %v281_v11   ;;  %609 = vperm.xlu0 %923, %v282_v14  }
  0x5f   : > { %613 = vperm.xlu1 %922, %v283_v12  }
  0x63   : > { %617 = vperm.xlu1 %922, %v284_v15  }
  0xc4   : > { %v300_v20 = vpop.permute.xlu0 %299  ;;  %v310_v21 = vpop.permute.xlu1 %309 }
  0xc8   : > { %v305_v26 = vpop.permute.xlu0 %304  ;;  %v315_v38 = vpop.permute.xlu1 %314 }
  0xcd   : > { %v1325_v57 = vpop.permute.xlu1 %577  ;;  %v574_v15 = vpop.permute.xlu0 %573 }
  0xd1   : > { %v1342_v10 = vpop.permute.xlu1 %581 }
 0x107   : > { %v396_v22 = vpop.f32.mrf.mxu0  ;;  %v485_v23 = vpop.f32.mrf.mxu1 }
 0x108   : > { %v1292_v24 = vadd.f32 %v396_v22, %v300_v20  ;;  %v1294_v25 = vadd.f32 %v485_v23, %v300_v20 }
 0x109   : > { %v398_v27 = vpop.f32.mrf.mxu0  ;;  %v487_v28 = vpop.f32.mrf.mxu1 }
 0x10a   : > { %v508_v29 = vmul.f32 0.70710677, %v1292_v24  ;;  %v510_v30 = vmul.f32 0.70710677, %v1294_v25  ;;  %v1298_v31 = vadd.f32 %v398_v27, %v300_v20  ;;  %v1300_v32 = vadd.f32 %v487_v28, %v300_v20 }
 0x10b   : > { %v402_v33 = vpop.f32.mrf.mxu0  ;;  %v491_v34 = vpop.f32.mrf.mxu1 }
 0x10c   : > { %924 = verf.f32 %v508_v29  ;;  %v509_v35 = vmul.f32 0.70710677, %v1298_v31  ;;  %v511_v36 = vmul.f32 0.70710677, %v1300_v32  ;;  %v1304_v37 = vadd.f32 %v402_v33, %v305_v26  ;;  %v636_v33 = vld [vmem:[%s1254_s13] sm:$0xff] }
 0x10d   : > { %926 = verf.f32 %v510_v30  ;;  %v1306_v39 = vadd.f32 %v491_v34, %v305_v26  ;;  %v404_v40 = vpop.f32.mrf.mxu0  ;;  %v493_v41 = vpop.f32.mrf.mxu1 }
 0x10e   : > { %928 = verf.f32 %v509_v35  ;;  %v512_v42 = vmul.f32 0.70710677, %v1304_v37  ;;  %v1309_v43 = vadd.f32 %v404_v40, %v305_v26  ;;  %v1311_v44 = vadd.f32 %v493_v41, %v305_v26  ;;  %v606_v34 = vpop.permute.xlu1 %605  ;;  %v638_v40 = vld [vmem:[%s1254_s13 + $0x10] sm:$0xff] }
 0x10f   : > { %930 = verf.f32 %v511_v36  ;;  %v514_v45 = vmul.f32 0.70710677, %v1306_v39  ;;  %v408_v46 = vpop.f32.mrf.mxu0  ;;  %v497_v47 = vpop.f32.mrf.mxu1 }
 0x110   : > { %932 = verf.f32 %v512_v42  ;;  %v513_v48 = vmul.f32 0.70710677, %v1309_v43  ;;  %v515_v49 = vmul.f32 0.70710677, %v1311_v44  ;;  %v1316_v50 = vadd.f32 %v408_v46, %v310_v21  ;;  %v637_v46 = vld [vmem:[%s1254_s13 + $0x8] sm:$0xff] }
 0x111   : > { %934 = verf.f32 %v514_v45  ;;  %v1318_v51 = vadd.f32 %v497_v47, %v310_v21  ;;  %v410_v52 = vpop.f32.mrf.mxu0  ;;  %v499_v53 = vpop.f32.mrf.mxu1 }
 0x112   : > { %936 = verf.f32 %v513_v48  ;;  %v516_v54 = vmul.f32 0.70710677, %v1316_v50  ;;  %v1321_v55 = vadd.f32 %v410_v52, %v310_v21  ;;  %v1323_v56 = vadd.f32 %v499_v53, %v310_v21  ;;  %v1352_v48 = vpop.permute.xlu0 %585 }
 0x113   : > { %938 = verf.f32 %v515_v49  ;;  %v518_v58 = vmul.f32 0.70710677, %v1318_v51  ;;  %v414_v59 = vpop.f32.mrf.mxu0  ;;  %v503_v60 = vpop.f32.mrf.mxu1 }
 0x114   : > { %940 = verf.f32 %v516_v54  ;;  %v517_v61 = vmul.f32 0.70710677, %v1321_v55  ;;  %v519_v62 = vmul.f32 0.70710677, %v1323_v56  ;;  %v1330_v63 = vadd.f32 %v414_v59, %v315_v38  ;;  %v639_v54 = vld [vmem:[%s1254_s13 + $0x18] sm:$0xff] }
 0x115   : > { %942 = verf.f32 %v518_v58  ;;  %v1332_v0 = vadd.f32 %v503_v60, %v315_v38  ;;  %v416_v1 = vpop.f32.mrf.mxu0  ;;  %v505_v2 = vpop.f32.mrf.mxu1 }
 0x116   : > { %944 = verf.f32 %v517_v61  ;;  %v520_v3 = vmul.f32 0.70710677, %v1330_v63  ;;  %v1335_v4 = vadd.f32 %v416_v1, %v315_v38  ;;  %v1337_v5 = vadd.f32 %v505_v2, %v315_v38 }
 0x117   : > { %946 = verf.f32 %v519_v62  ;;  %v522_v6 = vmul.f32 0.70710677, %v1332_v0 }
 0x118   : > { %948 = verf.f32 %v520_v3  ;;  %v521_v7 = vmul.f32 0.70710677, %v1335_v4  ;;  %v523_v8 = vmul.f32 0.70710677, %v1337_v5 }
 0x119   : > { %v925_v9 = vpop.eup %924  ;;  %950 = verf.f32 %v522_v6 }
 0x11a   : > { %v927_v11 = vpop.eup %926  ;;  %952 = verf.f32 %v521_v7  ;;  %v540_v12 = vadd.f32 1.0, %v925_v9 }
 0x11b   : > { %v929_v13 = vpop.eup %928  ;;  %954 = verf.f32 %v523_v8  ;;  %v542_v14 = vadd.f32 1.0, %v927_v11 }
 0x11c   : > { %v931_v16 = vpop.eup %930  ;;  %v541_v17 = vadd.f32 1.0, %v929_v13  ;;  %v556_v18 = vmul.f32 %v540_v12, %v1292_v24 }
 0x11d   : > { %v933_v19 = vpop.eup %932  ;;  %v543_v20 = vadd.f32 1.0, %v931_v16  ;;  %v558_v21 = vmul.f32 %v542_v14, %v1294_v25 }
 0x11e   : > { %v935_v22 = vpop.eup %934  ;;  %v557_v23 = vmul.f32 %v541_v17, %v1298_v31  ;;  %v588_v26 = vmul.f32 %v574_v15, %v556_v18  ;;  %v544_v27 = vadd.f32 1.0, %v933_v19  ;;  %v644_v19 = vld [vmem:[%s1254_s13 + $0x40] sm:$0xff] }
 0x11f   : > { %v937_v28 = vpop.eup %936  ;;  %v559_v29 = vmul.f32 %v543_v20, %v1300_v32  ;;  %v590_v30 = vmul.f32 %v574_v15, %v558_v21  ;;  %v546_v35 = vadd.f32 1.0, %v935_v22  ;;  %v614_v20 = vpop.permute.xlu1 %613 }
 0x120   : > { %v939_v36 = vpop.eup %938  ;;  %v545_v24 = vadd.f32 1.0, %v937_v28  ;;  %v589_v38 = vmul.f32 %v574_v15, %v557_v23  ;;  %v620_v41 = vadd.f32 %v606_v34, %v588_v26  ;;  %v560_v25 = vmul.f32 %v544_v27, %v1304_v37  ;;  %v610_v21 = vpop.permute.xlu0 %609 }
 0x121   : > { %v941_v42 = vpop.eup %940  ;;  %v547_v31 = vadd.f32 1.0, %v939_v36  ;;  %v591_v45 = vmul.f32 %v574_v15, %v559_v29  ;;  %v622_v47 = vadd.f32 %v606_v34, %v590_v30  ;;  %v562_v32 = vmul.f32 %v546_v35, %v1306_v39  ;;  %v640_v35 = vld [vmem:[%s1254_s13 + $0x20] sm:$0xff] }
 0x122   : > { %v943_v49 = vpop.eup %942  ;;  %v561_v52 = vmul.f32 %v545_v24, %v1309_v43  ;;  %v548_v53 = vadd.f32 1.0, %v941_v42  ;;  %v621_v58 = vadd.f32 %v606_v34, %v589_v38  ;;  %v652_v59 = vadd.f32 %v636_v33, %v620_v41  ;;  %v647_v24 = vld [vmem:[%s1254_s13 + $0x58] sm:$0xff] }
 0x123   : > { %v945_v60 = vpop.eup %944  ;;  %v563_v37 = vmul.f32 %v547_v31, %v1311_v44  ;;  %v550_v61 = vadd.f32 1.0, %v943_v49  ;;  %v623_v62 = vadd.f32 %v606_v34, %v591_v45  ;;  %v654_v1 = vadd.f32 %v638_v40, %v622_v47  ;;  %v645_v34 = vld [vmem:[%s1254_s13 + $0x48] sm:$0xff]  ;;  %v642_v31 = vld [vmem:[%s1254_s13 + $0x30] sm:$0xff] }
 0x124   : > { %v947_v2 = vpop.eup %946  ;;  %v564_v3 = vmul.f32 %v548_v53, %v1316_v50  ;;  %v549_v6 = vadd.f32 1.0, %v945_v60  ;;  %v653_v7 = vadd.f32 %v637_v46, %v621_v58  ;;  %668 = vst [vmem:[%s1361_s26] sm:$0xff] %v652_v59  ;;  %v592_v39 = vmul.f32 %v1325_v57, %v560_v25  ;;  %v641_v40 = vld [vmem:[%s1254_s13 + $0x28] sm:$0xff]  ;;  %v648_v59 = vld [vmem:[%s1254_s13 + $0x60] sm:$0xff] }
 0x125   : > { %v949_v43 = vpop.eup %948  ;;  %v566_v44 = vmul.f32 %v550_v61, %v1318_v51  ;;  %v551_v8 = vadd.f32 1.0, %v947_v2  ;;  %v655_v9 = vadd.f32 %v639_v54, %v623_v62  ;;  %670 = vst [vmem:[%s1361_s26 + $0x10] sm:$0xff] %v654_v1  ;;  %v593_v50 = vmul.f32 %v1325_v57, %v561_v52  ;;  %v649_v60 = vld [vmem:[%s1254_s13 + $0x68] sm:$0xff]  ;;  %v650_v1 = vld [vmem:[%s1254_s13 + $0x70] sm:$0xff]  ;;  %v651_v2 = vld [vmem:[%s1254_s13 + $0x78] sm:$0xff] }
 0x126   : > { %v951_v11 = vpop.eup %950  ;;  %v565_v12 = vmul.f32 %v549_v6, %v1321_v55  ;;  %v552_v13 = vadd.f32 1.0, %v949_v43  ;;  %v596_v14 = vmul.f32 %v1342_v10, %v564_v3  ;;  %669 = vst [vmem:[%s1361_s26 + $0x8] sm:$0xff] %v653_v7  ;;  %v594_v15 = vmul.f32 %v1325_v57, %v562_v32 }
 0x127   : > { %v953_v16 = vpop.eup %952  ;;  %v567_v17 = vmul.f32 %v551_v8, %v1323_v56  ;;  %v554_v51 = vadd.f32 1.0, %v951_v11  ;;  %v598_v18 = vmul.f32 %v1342_v10, %v566_v44  ;;  %671 = vst [vmem:[%s1361_s26 + $0x18] sm:$0xff] %v655_v9  ;;  %v595_v55 = vmul.f32 %v1325_v57, %v563_v37  ;;  %v646_v56 = vld [vmem:[%s1254_s13 + $0x50] sm:$0xff]  ;;  %v618_v37 = vpop.permute.xlu1 %617 }
 0x128   : > { %v955_v22 = vpop.eup %954  ;;  %v568_v23 = vmul.f32 %v552_v13, %v1330_v63  ;;  %v553_v26 = vadd.f32 1.0, %v953_v16  ;;  %v597_v27 = vmul.f32 %v1342_v10, %v565_v12  ;;  %v628_v28 = vadd.f32 %v614_v20, %v596_v14 }
 0x129   : > { %v570_v29 = vmul.f32 %v554_v51, %v1332_v0  ;;  %v555_v30 = vadd.f32 1.0, %v955_v22  ;;  %v599_v33 = vmul.f32 %v1342_v10, %v567_v17  ;;  %v630_v57 = vadd.f32 %v614_v20, %v598_v18  ;;  %v643_v10 = vld [vmem:[%s1254_s13 + $0x38] sm:$0xff]  ;;  %s685_s13 = scalar_lea.sflag [#allocation4], %s1242_s5 }
 0x12a   : > { %v569_v36 = vmul.f32 %v553_v26, %v1335_v4  ;;  %v629_v63 = vadd.f32 %v614_v20, %v597_v27  ;;  %v660_v38 = vadd.f32 %v644_v19, %v628_v28  ;;  %v624_v41 = vadd.f32 %v610_v21, %v592_v39 }
 0x12b   : > { %v571_v25 = vmul.f32 %v555_v30, %v1337_v5  ;;  %v631_v0 = vadd.f32 %v614_v20, %v599_v33  ;;  %v662_v42 = vadd.f32 %v646_v56, %v630_v57  ;;  %v625_v45 = vadd.f32 %v610_v21, %v593_v50 }
 0x12c   : > { %v661_v46 = vadd.f32 %v645_v34, %v629_v63  ;;  %676 = vst [vmem:[%s1361_s26 + $0x40] sm:$0xff] %v660_v38  ;;  %v626_v4 = vadd.f32 %v610_v21, %v594_v15  ;;  %v627_v47 = vadd.f32 %v610_v21, %v595_v55  ;;  %v656_v32 = vadd.f32 %v640_v35, %v624_v41 }
 0x12d   : > { %v663_v49 = vadd.f32 %v647_v24, %v631_v0  ;;  %678 = vst [vmem:[%s1361_s26 + $0x50] sm:$0xff] %v662_v42  ;;  %v657_v5 = vadd.f32 %v641_v40, %v625_v45  ;;  %v600_v52 = vmul.f32 %v1352_v48, %v568_v23  ;;  %v601_v53 = vmul.f32 %v1352_v48, %v569_v36 }
 0x12e   : > { %677 = vst [vmem:[%s1361_s26 + $0x48] sm:$0xff] %v661_v46  ;;  %v658_v54 = vadd.f32 %v642_v31, %v626_v4  ;;  %v659_v58 = vadd.f32 %v643_v10, %v627_v47  ;;  %672 = vst [vmem:[%s1361_s26 + $0x20] sm:$0xff] %v656_v32  ;;  %v602_v61 = vmul.f32 %v1352_v48, %v570_v29 }
 0x12f   : > { %v603_v62 = vmul.f32 %v1352_v48, %v571_v25  ;;  %679 = vst [vmem:[%s1361_s26 + $0x58] sm:$0xff] %v663_v49  ;;  %673 = vst [vmem:[%s1361_s26 + $0x28] sm:$0xff] %v657_v5  ;;  %v632_v3 = vadd.f32 %v618_v37, %v600_v52  ;;  %v633_v6 = vadd.f32 %v618_v37, %v601_v53 }
 0x130   : > { %674 = vst [vmem:[%s1361_s26 + $0x30] sm:$0xff] %v658_v54  ;;  %675 = vst [vmem:[%s1361_s26 + $0x38] sm:$0xff] %v659_v58  ;;  %v634_v7 = vadd.f32 %v618_v37, %v602_v61 }
 0x131   : > { %v635_v39 = vadd.f32 %v618_v37, %v603_v62  ;;  %v664_v43 = vadd.f32 %v648_v59, %v632_v3  ;;  %v665_v48 = vadd.f32 %v649_v60, %v633_v6 }
 0x132   : > { %v666_v44 = vadd.f32 %v650_v1, %v634_v7 }
 0x133   : > { %v667_v8 = vadd.f32 %v651_v2, %v635_v39  ;;  %680 = vst [vmem:[%s1361_s26 + $0x60] sm:$0xff] %v664_v43  ;;  %681 = vst [vmem:[%s1361_s26 + $0x68] sm:$0xff] %v665_v48 }
 0x134   : > { %682 = vst [vmem:[%s1361_s26 + $0x70] sm:$0xff] %v666_v44 }
 0x135   : > { %683 = vst [vmem:[%s1361_s26 + $0x78] sm:$0xff] %v667_v8 }
 0x136   : > { %1025 = shalt.err (!%p1022_p7)
}
 0x137   : > { %s1026_s12 = scalar_lea.hbm %s1411_s21, 2048  ;;  %s1030_s8 = scalar_lea.hbm %s1469_s4, 4096 }
 0x138   : > { %p1027_p1 = scmp.ne.s32.totalorder %s1411_s21, %s1026_s12  ;;  %p1031_p3 = scmp.lt.s32.totalorder %s1411_s21, %s1469_s4 }
 0x139   : > { %p1032_p8 = scmp.lt.s32.totalorder %s1030_s8, %s1026_s12 }
 0x13a   : > { %p1028_p10 = pnand %p1027_p1, %p1185_p9 }
 0x13b   : > { %p1033_p0 = por %p1032_p8, %p1031_p3 }
 0x13c   : > { %p1029_p13 = pneg %p1028_p10 }
 0x13e   : > { %p1034_p2 = pnand %p1033_p0, %p1029_p13 }
 0x140   : > { %1037 = shalt.err (!%p1034_p2)
}
 0x141   : > { %s1107_s27 = smov 512   ;;  %s1108_s26 = smov 32  }
 0x142   : > { %847 = dma.vmem_to_hbm [thread:$0]  (%p1185_p9), %s1413_s6, 2048, %s1411_s21, %s685_s13, %s1107_s27, %s1107_s27, %s1108_s26  }
 0x143 PF: > { %s715_s0 = sand.u32 1, %s1076_s15   ;;  %p857_p5 = pnand %p816_p12, %p1192_p11 }
 0x144   : > { %s716_s18 = scalar_lea.sflag [#allocation4], %s715_s0 }
 0x145   : > { %p858_p6 = pneg %p857_p5 }
 0x147   : > { %1071 = dma.done.wait (%p858_p6), %s716_s18, 2048  }
 0x148   : > { %1073 = vsyncadd (%p858_p6), %s716_s18, 4294965248  ;;  %s23_s20 = sadd.s32 1, %s1096_s20   ;;  %s1480_s28 = sld [smem:[#allocation11_spill]] }
 0x149   : > { %p20_p4 = scmp.ge.s32.totalorder %s23_s20, 4   ;;  %s1481_s15 = smov %s1080_s16 }
 0x14a   : > { %s1482_s16 = smov %s1084_s17  ;;  %s1483_s17 = smov %s1190_s29 }
 0x14b   : > { %s1484_s18 = smov %s1092_s19  ;;  %22 = sbr.rel (!%p20_p4) target bundleno = 10 (0xa), region = 94 }
 0x14e   : > { %s1485_s19 = smov %s1480_s28 }
 0x150   :  { %721 = vsyncpa [#allocation3], 1 }
 0x151   :  { %723 = vsyncpa [#allocation3 + $0x1], 1 }
 0x152   :  { %724 = vsyncpa [#allocation6], 1 }
 0x153   :  { %726 = vsyncpa [#allocation6 + $0x1], 1 }
 0x154   :  { %727 = vsyncpa [#allocation4], 1 }
 0x155   :  { %729 = vsyncpa [#allocation4 + $0x1], 1 }

</bundles_post_ra>
